<compile_context>
chip_gen: v7x
topology: tpu7x:2x2x1
jax: 0.10.0
libtpu: 0.0.40
codegen_flags: <defaults>
</compile_context>

<pallas_src>
import functools

import jax
import jax.numpy as jnp
import numpy as np
from jax import lax
from jax.experimental import pallas as pl
from jax.experimental.pallas import tpu as pltpu


def _yolo_ignore_kernel(cnt_ref, tgt_ref, pred_ref, mask_ref, out_ref,
                        *, n_chunks, rc, q):
    # cnt_ref : SMEM (B,) int32          -- valid-target count per batch
    # tgt_ref : SMEM (B, T*5) float32    -- per target: x1, y1, x2, y2, q*area
    # pred_ref: VMEM (4, R, 128) f32     -- cx, cy, w, h planes (pixel units)
    # mask_ref: VMEM (R, 128)            -- incoming no-obj mask (native dtype)
    # out_ref : VMEM (R, 128)            -- updated no-obj mask (aliased)
    b = pl.program_id(0)
    n_valid = cnt_ref[b]

    def do_chunk(c):
        if isinstance(c, int):
            r0 = c * rc
        else:
            r0 = pl.multiple_of(c * rc, rc)
        rows = pl.ds(r0, rc)

        cx = pred_ref[0, rows, :]                  # (rc, 128)
        cy = pred_ref[1, rows, :]
        w = pred_ref[2, rows, :]
        h = pred_ref[3, rows, :]
        hw = 0.5 * w
        hh = 0.5 * h
        px1 = cx - hw
        px2 = cx + hw
        py1 = cy - hh
        py2 = cy + hh
        c_p = q * ((px2 - px1) * (py2 - py1))      # q * area_p, loop-invariant

        def target_body(t, margin):
            base = t * 5
            tx1 = tgt_ref[b, base]                 # SMEM scalars, splat by VPU
            ty1 = tgt_ref[b, base + 1]
            tx2 = tgt_ref[b, base + 2]
            ty2 = tgt_ref[b, base + 3]
            c_t = tgt_ref[b, base + 4]             # q * area_t (precomputed)
            iw = jnp.maximum(jnp.minimum(px2, tx2) - jnp.maximum(px1, tx1), 0.0)
            ih = jnp.maximum(jnp.minimum(py2, ty2) - jnp.maximum(py1, ty1), 0.0)
            return jnp.maximum(margin, iw * ih - c_t)

        margin = lax.fori_loop(
            0, n_valid, target_body,
            jnp.full((rc, 128), -jnp.inf, jnp.float32))

        m = mask_ref[rows, :]
        out_ref[rows, :] = jnp.where(margin > c_p, jnp.zeros_like(m), m)

    if n_chunks == 1:
        do_chunk(0)
    else:
        pl.loop(0, n_chunks)(do_chunk)


def yolo_ignore(batch_predict_boxes, batch_targets, target_valid, no_obj_mask,
                input_size, ignore_threshold=0.5):
    """
    batch_predict_boxes: [B, A, H, W, 4] float32, cxcywh (pixel/grid units)
    batch_targets      : [B, T, 4] float32, normalized cxcywh (padded rows last)
    target_valid       : [B, T] {0,1}, valid rows first (prefix padding)
    no_obj_mask        : [B, A, H, W] float
    returns updated no_obj_mask [B, A, H, W]
    """
    B, A, H, W, _ = batch_predict_boxes.shape
    T = batch_targets.shape[1]
    N = A * H * W
    in_h, in_w = float(input_size[0]), float(input_size[1])
    thr = float(ignore_threshold)
    q = thr / (1.0 + thr)

    # --- pixel-axis tiling: lane-dense (R, 128); R % 8 == 0; <=32-row chunks --
    rows = -(-N // 128)
    if rows <= 32:
        R = -(-rows // 8) * 8
        rc = R
    else:
        rc = 32
        R = -(-rows // rc) * rc
    Npad = R * 128
    n_chunks = R // rc

    # --- predicted boxes: [B,A,H,W,4] -> coordinate-major (B, 4, R, 128) ------
    # TODO(synk): have the upstream producer emit coordinate-major [B, 4, N]
    # directly so this HBM-side transpose (strided gather) disappears.
    pred = jnp.moveaxis(
        batch_predict_boxes.reshape(B, N, 4).astype(jnp.float32), 2, 1)
    pred = jnp.pad(pred, ((0, 0), (0, 0), (0, Npad - N))).reshape(B, 4, R, 128)

    # --- no-obj mask -> (B, R, 128), native dtype, aliased to output ----------
    mask = jnp.pad(no_obj_mask.reshape(B, N), ((0, 0), (0, Npad - N)))
    mask = mask.reshape(B, R, 128)

    # --- targets: normalized cxcywh -> scaled xyxy + q*area, packed for SMEM --
    t = batch_targets.astype(jnp.float32)
    tcx = t[..., 0] * in_w
    tcy = t[..., 1] * in_h
    tw = t[..., 2] * in_w
    th = t[..., 3] * in_h
    tx1 = tcx - 0.5 * tw
    ty1 = tcy - 0.5 * th
    tx2 = tcx + 0.5 * tw
    ty2 = tcy + 0.5 * th
    c_t = q * ((tx2 - tx1) * (ty2 - ty1))
    tgt_flat = jnp.stack([tx1, ty1, tx2, ty2, c_t], axis=-1).reshape(B, T * 5)

    # --- per-batch valid-target counts (prefix padding assumed) ---------------
    counts = jnp.sum(target_valid.astype(jnp.int32), axis=-1)

    kernel = functools.partial(_yolo_ignore_kernel,
                               n_chunks=n_chunks, rc=rc, q=q)

    out = pl.pallas_call(
        kernel,
        out_shape=jax.ShapeDtypeStruct((B, R, 128), mask.dtype),
        grid_spec=pltpu.PrefetchScalarGridSpec(
            num_scalar_prefetch=2,
            grid=(B,),
            in_specs=[
                pl.BlockSpec((None, 4, R, 128), lambda b, cnt, tgt: (b, 0, 0, 0)),
                pl.BlockSpec((None, R, 128), lambda b, cnt, tgt: (b, 0, 0)),
            ],
            out_specs=pl.BlockSpec((None, R, 128), lambda b, cnt, tgt: (b, 0, 0)),
        ),
        # operand order: counts=0, tgt_flat=1, pred=2, mask=3
        input_output_aliases={3: 0},
        compiler_params=pltpu.CompilerParams(
            dimension_semantics=("parallel",)),
    )(counts, tgt_flat, pred, mask)

    return out.reshape(B, Npad)[:, :N].reshape(B, A, H, W)


def _reference_numpy(pred_boxes, targets, valid, mask, input_size, thr):
    """Pure numpy reference mirroring the PyTorch forward."""
    B, A, H, W, _ = pred_boxes.shape
    in_h, in_w = input_size
    out = np.array(mask, copy=True)
    for b in range(B):
        nt = int(valid[b].sum())
        if nt == 0:
            continue
        t = np.array(targets[b][:nt], copy=True)
        tb = np.zeros_like(t)
        tb[:, [0, 2]] = t[:, [0, 2]] * in_w
        tb[:, [1, 3]] = t[:, [1, 3]] * in_h
        tx1 = tb[:, 0] - tb[:, 2] / 2
        ty1 = tb[:, 1] - tb[:, 3] / 2
        tx2 = tb[:, 0] + tb[:, 2] / 2
        ty2 = tb[:, 1] + tb[:, 3] / 2
        p = pred_boxes[b].reshape(-1, 4)
        px1 = p[:, 0] - p[:, 2] / 2
        py1 = p[:, 1] - p[:, 3] / 2
        px2 = p[:, 0] + p[:, 2] / 2
        py2 = p[:, 1] + p[:, 3] / 2
        ix1 = np.maximum(tx1[:, None], px1[None, :])
        iy1 = np.maximum(ty1[:, None], py1[None, :])
        ix2 = np.minimum(tx2[:, None], px2[None, :])
        iy2 = np.minimum(ty2[:, None], py2[None, :])
        inter = np.clip(ix2 - ix1, 0, None) * np.clip(iy2 - iy1, 0, None)
        at = ((tx2 - tx1) * (ty2 - ty1))[:, None]
        ap = ((px2 - px1) * (py2 - py1))[None, :]
        iou = inter / (at + ap - inter)
        max_iou = iou.max(axis=0).reshape(A, H, W)
        out[b][max_iou > thr] = 0
    return out


if __name__ == "__main__":
    B, A, H, W, T = 2, 3, 16, 16, 8
    input_size = (H, W)
    thr = 0.5

    key = jax.random.PRNGKey(0)
    k1, k2, k3, k4 = jax.random.split(key, 4)

    # Predicted boxes in pixel/grid units (cxcywh).
    pred_cxcy = jax.random.uniform(k1, (B, A, H, W, 2), minval=0.0, maxval=float(W))
    pred_wh = jax.random.uniform(k2, (B, A, H, W, 2), minval=1.0, maxval=float(W) / 2.0)
    pred_boxes = jnp.concatenate([pred_cxcy, pred_wh], axis=-1).astype(jnp.float32)

    # Padded targets: normalized cxcywh.
    tgt_cxcy = jax.random.uniform(k3, (B, T, 2), minval=0.1, maxval=0.9)
    tgt_wh = jax.random.uniform(k4, (B, T, 2), minval=0.05, maxval=0.5)
    targets = jnp.concatenate([tgt_cxcy, tgt_wh], axis=-1).astype(jnp.float32)

    # batch 0 has 5 real targets, batch 1 has 3 (valid rows first).
    counts = jnp.array([5, 3], dtype=jnp.int32)
    valid = (jnp.arange(T)[None, :] < counts[:, None]).astype(jnp.float32)

    no_obj_mask = jnp.ones((B, A, H, W), dtype=jnp.float32)

    out = yolo_ignore(pred_boxes, targets, valid, no_obj_mask, input_size, thr)
    out = jax.block_until_ready(out)

    ref = _reference_numpy(np.asarray(pred_boxes), np.asarray(targets),
                           np.asarray(valid), np.asarray(no_obj_mask),
                           input_size, thr)
    np.testing.assert_allclose(np.asarray(out), ref, rtol=0, atol=0)

    print("KERNEL_OK")
</pallas_src>

<mosaic_0001>
module attributes {stable_mosaic.version = 11 : i64} {
  func.func @_yolo_ignore_kernel(%arg0: i32, %arg1: memref<2xi32, #tpu.memory_space<smem>>, %arg2: memref<2x40xf32, #tpu.memory_space<smem>>, %arg3: memref<1x4x8x128xf32, #tpu.memory_space<vmem>>, %arg4: memref<1x8x128xf32, #tpu.memory_space<vmem>>, %arg5: memref<1x8x128xf32, #tpu.memory_space<vmem>>) attributes {dimension_semantics = [#tpu.dimension_semantics<parallel>], iteration_bounds = array<i64: 2>, scalar_prefetch = 2 : i64, scratch_operands = 0 : i64, tpu.core_type = #tpu.core_type<tc>, window_params = [{transform_indices = @transform_0, window_bounds = array<i64: 1, 4, 8, 128>}, {transform_indices = @transform_1, window_bounds = array<i64: 1, 8, 128>}, {transform_indices = @transform_2, window_bounds = array<i64: 1, 8, 128>}]} {
    %0 = arith.index_cast %arg0 : i32 to index
    %1 = memref.load %arg1[%0] : memref<2xi32, #tpu.memory_space<smem>>
    %c0 = arith.constant 0 : index
    %c0_0 = arith.constant 0 : index
    %c0_1 = arith.constant 0 : index
    %c0_2 = arith.constant 0 : index
    %2 = vector.load %arg3[%c0, %c0_0, %c0_1, %c0_2] : memref<1x4x8x128xf32, #tpu.memory_space<vmem>>, vector<1x1x8x128xf32>
    %3 = vector.shape_cast %2 : vector<1x1x8x128xf32> to vector<8x128xf32>
    %c0_3 = arith.constant 0 : index
    %c1 = arith.constant 1 : index
    %c0_4 = arith.constant 0 : index
    %c0_5 = arith.constant 0 : index
    %4 = vector.load %arg3[%c0_3, %c1, %c0_4, %c0_5] : memref<1x4x8x128xf32, #tpu.memory_space<vmem>>, vector<1x1x8x128xf32>
    %5 = vector.shape_cast %4 : vector<1x1x8x128xf32> to vector<8x128xf32>
    %c0_6 = arith.constant 0 : index
    %c2 = arith.constant 2 : index
    %c0_7 = arith.constant 0 : index
    %c0_8 = arith.constant 0 : index
    %6 = vector.load %arg3[%c0_6, %c2, %c0_7, %c0_8] : memref<1x4x8x128xf32, #tpu.memory_space<vmem>>, vector<1x1x8x128xf32>
    %7 = vector.shape_cast %6 : vector<1x1x8x128xf32> to vector<8x128xf32>
    %c0_9 = arith.constant 0 : index
    %c3 = arith.constant 3 : index
    %c0_10 = arith.constant 0 : index
    %c0_11 = arith.constant 0 : index
    %8 = vector.load %arg3[%c0_9, %c3, %c0_10, %c0_11] : memref<1x4x8x128xf32, #tpu.memory_space<vmem>>, vector<1x1x8x128xf32>
    %9 = vector.shape_cast %8 : vector<1x1x8x128xf32> to vector<8x128xf32>
    %cst = arith.constant 5.000000e-01 : f32
    %10 = vector.broadcast %cst : f32 to vector<8x128xf32>
    %11 = arith.mulf %10, %7 : vector<8x128xf32>
    %cst_12 = arith.constant 5.000000e-01 : f32
    %12 = vector.broadcast %cst_12 : f32 to vector<8x128xf32>
    %13 = arith.mulf %12, %9 : vector<8x128xf32>
    %14 = arith.subf %3, %11 : vector<8x128xf32>
    %15 = arith.addf %3, %11 : vector<8x128xf32>
    %16 = arith.subf %5, %13 : vector<8x128xf32>
    %17 = arith.addf %5, %13 : vector<8x128xf32>
    %18 = arith.subf %15, %14 : vector<8x128xf32>
    %19 = arith.subf %17, %16 : vector<8x128xf32>
    %20 = arith.mulf %18, %19 : vector<8x128xf32>
    %cst_13 = arith.constant 0.333333343 : f32
    %21 = vector.broadcast %cst_13 : f32 to vector<8x128xf32>
    %22 = arith.mulf %21, %20 : vector<8x128xf32>
    %cst_14 = arith.constant 0xFF800000 : f32
    %23 = vector.broadcast %cst_14 : f32 to vector<8x128xf32>
    %c0_i32 = arith.constant 0 : i32
    %24 = arith.subi %1, %c0_i32 : i32
    %25 = arith.addi %c0_i32, %24 : i32
    %c1_i32 = arith.constant 1 : i32
    %26 = scf.for %arg6 = %c0_i32 to %25 step %c1_i32 iter_args(%arg7 = %23) -> (vector<8x128xf32>)  : i32 {
      %c5_i32 = arith.constant 5 : i32
      %35 = arith.muli %arg6, %c5_i32 : i32
      %36 = arith.index_cast %arg0 : i32 to index
      %37 = arith.index_cast %35 : i32 to index
      %38 = memref.load %arg2[%36, %37] : memref<2x40xf32, #tpu.memory_space<smem>>
      %c1_i32_22 = arith.constant 1 : i32
      %39 = arith.addi %35, %c1_i32_22 : i32
      %40 = arith.index_cast %arg0 : i32 to index
      %41 = arith.index_cast %39 : i32 to index
      %42 = memref.load %arg2[%40, %41] : memref<2x40xf32, #tpu.memory_space<smem>>
      %c2_i32 = arith.constant 2 : i32
      %43 = arith.addi %35, %c2_i32 : i32
      %44 = arith.index_cast %arg0 : i32 to index
      %45 = arith.index_cast %43 : i32 to index
      %46 = memref.load %arg2[%44, %45] : memref<2x40xf32, #tpu.memory_space<smem>>
      %c3_i32 = arith.constant 3 : i32
      %47 = arith.addi %35, %c3_i32 : i32
      %48 = arith.index_cast %arg0 : i32 to index
      %49 = arith.index_cast %47 : i32 to index
      %50 = memref.load %arg2[%48, %49] : memref<2x40xf32, #tpu.memory_space<smem>>
      %c4_i32 = arith.constant 4 : i32
      %51 = arith.addi %35, %c4_i32 : i32
      %52 = arith.index_cast %arg0 : i32 to index
      %53 = arith.index_cast %51 : i32 to index
      %54 = memref.load %arg2[%52, %53] : memref<2x40xf32, #tpu.memory_space<smem>>
      %55 = vector.broadcast %46 : f32 to vector<8x128xf32>
      %56 = arith.minimumf %15, %55 : vector<8x128xf32>
      %57 = vector.broadcast %38 : f32 to vector<8x128xf32>
      %58 = arith.maximumf %14, %57 : vector<8x128xf32>
      %59 = arith.subf %56, %58 : vector<8x128xf32>
      %cst_23 = arith.constant 0.000000e+00 : f32
      %60 = vector.broadcast %cst_23 : f32 to vector<8x128xf32>
      %61 = arith.maximumf %59, %60 : vector<8x128xf32>
      %62 = vector.broadcast %50 : f32 to vector<8x128xf32>
      %63 = arith.minimumf %17, %62 : vector<8x128xf32>
      %64 = vector.broadcast %42 : f32 to vector<8x128xf32>
      %65 = arith.maximumf %16, %64 : vector<8x128xf32>
      %66 = arith.subf %63, %65 : vector<8x128xf32>
      %cst_24 = arith.constant 0.000000e+00 : f32
      %67 = vector.broadcast %cst_24 : f32 to vector<8x128xf32>
      %68 = arith.maximumf %66, %67 : vector<8x128xf32>
      %69 = arith.mulf %61, %68 : vector<8x128xf32>
      %70 = vector.broadcast %54 : f32 to vector<8x128xf32>
      %71 = arith.subf %69, %70 : vector<8x128xf32>
      %72 = arith.maximumf %arg7, %71 : vector<8x128xf32>
      scf.yield %72 : vector<8x128xf32>
    }
    %c0_15 = arith.constant 0 : index
    %c0_16 = arith.constant 0 : index
    %c0_17 = arith.constant 0 : index
    %27 = vector.load %arg4[%c0_15, %c0_16, %c0_17] : memref<1x8x128xf32, #tpu.memory_space<vmem>>, vector<1x8x128xf32>
    %28 = vector.shape_cast %27 : vector<1x8x128xf32> to vector<8x128xf32>
    %29 = arith.cmpf ogt, %26, %22 : vector<8x128xf32>
    %cst_18 = arith.constant 0.000000e+00 : f32
    %30 = vector.broadcast %cst_18 : f32 to vector<8x128xf32>
    %31 = arith.select %29, %30, %28 : vector<8x128xi1>, vector<8x128xf32>
    %c0_19 = arith.constant 0 : index
    %c0_20 = arith.constant 0 : index
    %c0_21 = arith.constant 0 : index
    %32 = vector.load %arg5[%c0_19, %c0_20, %c0_21] : memref<1x8x128xf32, #tpu.memory_space<vmem>>, vector<1x8x128xf32>
    %33 = vector.shape_cast %32 : vector<1x8x128xf32> to vector<8x128xf32>
    %34 = vector.shape_cast %31 : vector<8x128xf32> to vector<1x8x128xf32>
    tpu.vector_store %arg5[%c0_19, %c0_20, %c0_21], %34 {strides = array<i32>} : memref<1x8x128xf32, #tpu.memory_space<vmem>>, vector<1x8x128xf32>,
    return
  }
  func.func @transform_0(%arg0: i32, %arg1: memref<2xi32, #tpu.memory_space<smem>>, %arg2: memref<2x40xf32, #tpu.memory_space<smem>>) -> (i32, i32, i32, i32) {
    %c0_i32 = arith.constant 0 : i32
    %c0_i32_0 = arith.constant 0 : i32
    %c0_i32_1 = arith.constant 0 : i32
    %c0_i32_2 = arith.constant 0 : i32
    return %arg0, %c0_i32, %c0_i32_0, %c0_i32_1 : i32, i32, i32, i32
  }
  func.func @transform_1(%arg0: i32, %arg1: memref<2xi32, #tpu.memory_space<smem>>, %arg2: memref<2x40xf32, #tpu.memory_space<smem>>) -> (i32, i32, i32) {
    %c0_i32 = arith.constant 0 : i32
    %c0_i32_0 = arith.constant 0 : i32
    %c0_i32_1 = arith.constant 0 : i32
    return %arg0, %c0_i32, %c0_i32_0 : i32, i32, i32
  }
  func.func @transform_2(%arg0: i32, %arg1: memref<2xi32, #tpu.memory_space<smem>>, %arg2: memref<2x40xf32, #tpu.memory_space<smem>>) -> (i32, i32, i32) {
    %c0_i32 = arith.constant 0 : i32
    %c0_i32_0 = arith.constant 0 : i32
    %c0_i32_1 = arith.constant 0 : i32
    return %arg0, %c0_i32, %c0_i32_0 : i32, i32, i32
  }
}

</mosaic_0001>

<bundles_post_ra>
// kernel: tpu_custom_call.1
= control target key start
LH: loop header
LB: loop body
LE: loop exit
PB: predicated region body
PF: predicated region fallthrough
CT: control target
= control target key end

     0   :  { %s995_s0 = inlined_call_operand.vmem [shape: s32[2], index: 0, kind: input, shape index: {}]   ;;  %s996_s2 = inlined_call_operand.hbm [shape: f32[2,4,8,128], index: 2, kind: input, shape index: {}]   ;;  %s997_s3 = inlined_call_operand.hbm [shape: f32[2,8,128], index: 3, kind: input, shape index: {}, may-alias: {3,4}]   ;;  %s998_s4 = inlined_call_operand.hbm [shape: f32[2,8,128], index: 4, kind: output, shape index: {}, may-alias: {3,4}]   ;;  %s999_s1 = inlined_call_operand.vmem [shape: f32[2,40], index: 1, kind: input, shape index: {}]  }
   0x1   :  { %1009 = sst [smem:[#allocation22_spill]] %s996_s2  ;;  %s9_s17 = sshll.u32 %s995_s0, 4  ;;  %s10_s17 = int_to_ptr.vmem [resolvable:$true] %s9_s17 }
   0x2   :  { %1010 = sst [smem:[#allocation23_spill]] %s997_s3  ;;  %s13_s20 = sshll.u32 %s999_s1, 4  ;;  %s14_s20 = int_to_ptr.vmem [resolvable:$true] %s13_s20 }
   0x3   :  { %s521_s21 = scalar_lea.vmem %s10_s17, 16  ;;  %p526_p1 = scmp.lt.s32.totalorder %s10_s17, %s10_s17 }
   0x4   :  { %p522_p0 = scmp.ne.s32.totalorder %s10_s17, %s521_s21  ;;  %p527_p2 = scmp.lt.s32.totalorder %s521_s21, %s521_s21 }
   0x6   :  { %p528_p3 = por %p527_p2, %p526_p1 }
   0x8   :  { %p529_p4 = pnand %p528_p3, %p522_p0 }
   0xa   :  { %532 = shalt.err (!%p529_p4)  }
   0xb   :  { %s703_s22 = smov [#allocation3]   ;;  %s533_s23 = scalar_lea.vmem %s14_s20, 32 }
   0xc   :  { %12 = dma.vmem_to_smem %s10_s17, 16, %s703_s22, [#allocation2] }
   0xd   :  { %p534_p5 = scmp.ne.s32.totalorder %s14_s20, %s533_s23  ;;  %p538_p6 = scmp.lt.s32.totalorder %s14_s20, %s14_s20 }
   0xe   :  { %p539_p7 = scmp.lt.s32.totalorder %s533_s23, %s533_s23 }
  0x10   :  { %p540_p8 = por %p539_p7, %p538_p6 }
  0x12   :  { %p541_p9 = pnand %p540_p8, %p534_p5 }
  0x14   :  { %544 = shalt.err (!%p541_p9)  }
  0x15   :  { %s704_s0 = smov [#allocation4]  }
  0x16   :  { %16 = dma.vmem_to_smem %s14_s20, 32, %s704_s0, [#allocation2] }
  0x17   :  { %661 = dma.done.wait [#allocation2], 48 }
  0x18   :  { %662 = vsyncadd [#allocation2], 4294967248 }
  0x19   :  { %18 = sfence }
  0x1a   :  { %19 = vsyncpa [#allocation6], 0 }
  0x1b   :  { %21 = vsyncpa [#allocation6 + $0x1], 0 }
  0x1c   :  { %22 = vsyncpa [#allocation9], 0 }
  0x1d   :  { %24 = vsyncpa [#allocation9 + $0x1], 0 }
  0x1e   :  { %25 = vsyncpa [#allocation7], 0 }
  0x1f   :  { %27 = vsyncpa [#allocation7 + $0x1], 0  ;;  %s741_s1 = smov 0   ;;  %s743_s24 = smov 0  }
  0x20   :  { %s745_s25 = smov 0   ;;  %s747_s26 = smov 0  }
  0x21 LB: > { %1011 = sst [smem:[#allocation15_spill]] %s677_s1  ;;  %s762_s27 = sadd.s32 4294967295, %s689_s26   ;;  %s689_s26 = sphi %s747_s26, %s1035_s26   ;;  %s685_s25 = sphi %s745_s25, %s1038_s25   ;;  %s681_s24 = sphi %s743_s24, %s1037_s24   ;;  %s677_s1 = sphi %s741_s1, %s1036_s1  }
  0x22   : > { %1012 = sst [smem:[#allocation16_spill]] %s681_s24  ;;  %s416_s28 = sadd.s32 4294967294, %s689_s26  }
  0x23   : > { %1013 = sst [smem:[#allocation17_spill]] %s685_s25  ;;  %s766_s29 = sadd.s32 1, %s689_s26  }
  0x24   : > { %1014 = sst [smem:[#allocation18_spill]] %s689_s26  ;;  %s40_s30 = sadd.s32 1, %s685_s25 }
  0x25   : > { %1015 = sst [smem:[#allocation19_spill]] %s766_s29  ;;  %s37_s5 = ssub.s32 %s689_s26, %s766_s29 }
  0x26   : > { %p47_p10 = scmp.ne.s32.totalorder %s685_s25, %s681_s24  ;;  %p38_p11 = scmp.eq.s32.totalorder %s37_s5, 0 }
  0x27   : > { %p48_p12 = scmp.eq.s32.totalorder %s689_s26, 0  ;;  %p53_p13 = scmp.ne.s32.totalorder %s681_s24, %s677_s1 }
  0x28   : > { %p54_p0 = scmp.eq.s32.totalorder %s762_s27, 0  ;;  %p103_p3 = scmp.eq.s32.totalorder %s762_s27, 1 }
  0x29   : > { %s778_s6 = scalar_select %p38_p11, %s685_s25, %s40_s30  }
  0x2a   : > { %p780_p1 = por %p48_p12, %p47_p10  ;;  %p784_p2 = por %p54_p0, %p53_p13 }
  0x2b   : > { %1016 = sst [smem:[#allocation20_spill]] %s778_s6  ;;  %p109_p4 = scmp.eq.s32.totalorder %s416_s28, 1 }
  0x2c   : > { %s1018_s8 = scalar_select %p784_p2, 1, 0 }
  0x2d   : > { %p459_p6 = scmp.lt.s32.totalorder %s689_s26, 2  ;;  %p791_p7 = por %p103_p3, %p47_p10 }
  0x2e   : > { %p795_p8 = por %p109_p4, %p53_p13  ;;  %s800_s11 = sand.u32 1, %s685_s25  }
  0x2f   : > { %s1019_s9 = scalar_select %p791_p7, 1, 0 }
  0x30   : > { %s1020_s10 = scalar_select %p795_p8, 1, 0 }
  0x31   : > { %s441_s12 = sshll.u32 %s689_s26, 9  ;;  %s419_s13 = sshll.u32 %s800_s11, 5 }
  0x32   : > { %1021 = sst [smem:[#allocation21_spill]] %s1020_s10  ;;  %s133_s17 = scalar_lea.vmem [#allocation5], %s419_s13 }
  0x33   : > { %s1022_s2 = sld [smem:[#allocation22_spill]]  ;;  %s140_s18 = sshll.u32 %s133_s17, 4  ;;  %s815_s18 = int_to_ptr.vmem [resolvable:$true] %s140_s18 }
  0x34   : > { %p811_p9 = pnand %p459_p6, %p780_p1  ;;  %s130_s20 = scalar_lea.sflag [#allocation6], %s800_s11 }
  0x36   : > { %p547_p11 = pneg %p811_p9 }
  0x39   : > { %s807_s16 = scalar_lea.hbm %s1022_s2, %s441_s12  ;;  %s550_s0 = scalar_lea.hbm %s1022_s2, 1024 }
  0x3a   : > { %s545_s21 = scalar_lea.hbm %s807_s16, 512  ;;  %p551_p0 = scmp.lt.u32.totalorder %s807_s16, %s1022_s2 }
  0x3b   : > { %p546_p10 = scmp.ne.s32.totalorder %s807_s16, %s545_s21  ;;  %p552_p1 = scmp.lt.u32.totalorder %s550_s0, %s545_s21 }
  0x3c   : > { %p554_p4 = scmp.lt.u32.totalorder %s545_s21, %s807_s16 }
  0x3d   : > { %p548_p12 = pnand %p547_p11, %p546_p10  ;;  %p553_p3 = por %p552_p1, %p551_p0 }
  0x3f   : > { %p549_p13 = pneg %p548_p12  ;;  %p555_p6 = por %p554_p4, %p553_p3 }
  0x41   : > { %p556_p5 = pnand %p555_p6, %p549_p13 }
  0x43   : > { %559 = shalt.err (!%p556_p5)
}
  0x44   : > { %s560_s5 = scalar_lea.vmem %s815_s18, 512  ;;  %s705_s7 = smov [#allocation5]  }
  0x45   : > { %p561_p10 = scmp.ne.s32.totalorder %s815_s18, %s560_s5  ;;  %s565_s12 = sshll.u32 %s705_s7, 4  ;;  %s566_s12 = int_to_ptr.vmem [resolvable:$false] %s565_s12 }
  0x46   : > { %s567_s13 = scalar_lea.vmem %s566_s12, 1024  ;;  %p568_p7 = scmp.lt.s32.totalorder %s815_s18, %s566_s12 }
  0x47   : > { %p563_p12 = pnand %p561_p10, %p547_p11  ;;  %p569_p0 = scmp.lt.s32.totalorder %s567_s13, %s560_s5 }
  0x49   : > { %p564_p8 = pneg %p563_p12  ;;  %p570_p1 = por %p569_p0, %p568_p7 }
  0x4b   : > { %p571_p3 = pnand %p570_p1, %p564_p8 }
  0x4d   : > { %574 = shalt.err (!%p571_p3)
}
  0x4e   : > { %s706_s14 = smov 128   ;;  %s707_s15 = smov 8  }
  0x4f   : > { %451 = dma.hbm_to_vmem [thread:$0]  (!%p811_p9), %s807_s16, 512, %s815_s18, %s130_s20, %s706_s14, %s706_s14, %s707_s15  }
  0x50   : > { %p424_p5 = scmp.ge.s32.totalorder %s689_s26, 1  ;;  %p166_p13 = scmp.lt.s32.totalorder %s689_s26, 3 }
  0x51   : > { %s422_s17 = sshll.u32 %s800_s11, 3  ;;  %s423_s22 = sshll.u32 %s689_s26, 7 }
  0x52   : > { %p848_p7 = pnand %p424_p5, %p166_p13  ;;  %s154_s23 = scalar_lea.vmem [#allocation8], %s422_s17 }
  0x53   : > { %s161_s0 = sshll.u32 %s154_s23, 4  ;;  %s1025_s3 = sld [smem:[#allocation23_spill]]  ;;  %s162_s0 = int_to_ptr.vmem [resolvable:$true] %s161_s0 }
  0x54   : > { %s1024_s21 = scalar_select %p848_p7, 1, 0 }
  0x55   : > { %s151_s16 = scalar_lea.sflag [#allocation9], %s800_s11 }
  0x59   : > { %s856_s5 = scalar_lea.hbm %s1025_s3, %s423_s22  ;;  %s580_s12 = scalar_lea.hbm %s1025_s3, 256 }
  0x5a   : > { %s575_s18 = scalar_lea.hbm %s856_s5, 128  ;;  %p581_p10 = scmp.lt.u32.totalorder %s856_s5, %s1025_s3 }
  0x5b   : > { %p576_p8 = scmp.ne.s32.totalorder %s856_s5, %s575_s18  ;;  %p582_p12 = scmp.lt.u32.totalorder %s580_s12, %s575_s18 }
  0x5c   : > { %p584_p1 = scmp.lt.u32.totalorder %s575_s18, %s856_s5 }
  0x5d   : > { %p578_p4 = pnand %p576_p8, %p547_p11  ;;  %p583_p0 = por %p582_p12, %p581_p10 }
  0x5f   : > { %p579_p6 = pneg %p578_p4  ;;  %p585_p3 = por %p584_p1, %p583_p0 }
  0x61   : > { %p586_p5 = pnand %p585_p3, %p579_p6 }
  0x63   : > { %589 = shalt.err (!%p586_p5)
}
  0x64   : > { %s590_s11 = scalar_lea.vmem %s162_s0, 128  ;;  %s708_s15 = smov [#allocation8]  }
  0x65   : > { %p591_p13 = scmp.ne.s32.totalorder %s162_s0, %s590_s11  ;;  %s595_s17 = sshll.u32 %s708_s15, 4  ;;  %s596_s17 = int_to_ptr.vmem [resolvable:$false] %s595_s17 }
  0x66   : > { %s597_s22 = scalar_lea.vmem %s596_s17, 256  ;;  %p598_p2 = scmp.lt.s32.totalorder %s162_s0, %s596_s17 }
  0x67   : > { %p593_p8 = pnand %p591_p13, %p547_p11  ;;  %p599_p7 = scmp.lt.s32.totalorder %s597_s22, %s590_s11 }
  0x69   : > { %p594_p4 = pneg %p593_p8  ;;  %p600_p10 = por %p599_p7, %p598_p2 }
  0x6b   : > { %p601_p12 = pnand %p600_p10, %p594_p4 }
  0x6d   : > { %604 = shalt.err (!%p601_p12)
}
  0x6e   : > { %454 = dma.hbm_to_vmem [thread:$0]  (!%p811_p9), %s856_s5, 128, %s162_s0, %s151_s16  }
  0x6f   : > { %p1026_p6 = scmp.ne.s32.totalorder %s1024_s21, 0 }
  0x70   : > { %s881_s23 = sand.u32 (!%p1026_p6), 1, %s681_s24   ;;  %p1027_p11 = scmp.ne.s32.totalorder (!%p1026_p6), %s1018_s8, 0 }
  0x71   : > { %170 = sbr.rel (%p1026_p6) target bundleno = 200 (0xc8), region = 28  ;;  %s425_s28 = sshll.u32 (!%p1026_p6), %s881_s23, 5 }
  0x72   : > { %s173_s30 = scalar_lea.sflag (!%p1026_p6), [#allocation6], %s881_s23  ;;  %s176_s18 = scalar_lea.vmem (!%p1026_p6), [#allocation5], %s425_s28 }
  0x78   : > { %664 = dma.done.wait (%p1027_p11), %s173_s30, 512  }
  0x79   : > { %666 = vsyncadd (%p1027_p11), %s173_s30, 4294966784  ;;  %s426_s19 = sshll.u32 %s881_s23, 3  ;;  %s182_s21 = scalar_lea.sflag [#allocation9], %s881_s23 }
  0x7a   : > { %s891_s0 = scalar_lea.vmem [#allocation8], %s426_s19 }
  0x7b   : > { %668 = dma.done.wait (%p1027_p11), %s182_s21, 128  }
  0x7c   : > { %670 = vsyncadd (%p1027_p11), %s182_s21, 4294967168  ;;  %s898_s5 = sld [smem:[#allocation3 + %s762_s27]]  ;;  %v212_v0 = vld [vmem:[%s176_s18] sm:$0xff]  ;;  %v429_v1 = vld [vmem:[%s176_s18 + $0x10] sm:$0xff]  ;;  %s914_s8 = scalar_lea.vmem [#allocation10], %s426_s19  ;;  %v917_v14 = vmov -inf  }
  0x7d   : > { %v428_v2 = vld [vmem:[%s176_s18 + $0x8] sm:$0xff]  ;;  %v430_v3 = vld [vmem:[%s176_s18 + $0x18] sm:$0xff]  ;;  %v219_v4 = vmul.f32 0.5, %v429_v1 }
  0x7e   : > { %v220_v5 = vmul.f32 0.5, %v430_v3 }
  0x7f   : > { %v900_v6 = vsub.f32 %v212_v0, %v219_v4  ;;  %v902_v7 = vadd.f32 %v219_v4, %v212_v0 }
  0x80   : > { %v904_v8 = vsub.f32 %v428_v2, %v220_v5  ;;  %v906_v9 = vadd.f32 %v428_v2, %v220_v5 }
  0x81   : > { %v225_v10 = vsub.f32 %v902_v7, %v900_v6 }
  0x82   : > { %v226_v11 = vsub.f32 %v906_v9, %v904_v8  ;;  %p431_p2 = scmp.le.s32.totalorder %s898_s5, 0 }
  0x83   : > { %v691_v15 = vmov (!%p431_p2), -inf   ;;  %s919_s16 = smov (!%p431_p2), 0  }
  0x84   : > { %v227_v12 = vmul.f32 %v226_v11, %v225_v10  ;;  %378 = sbr.rel (%p431_p2) target bundleno = 175 (0xaf), region = 90 }
  0x86   : > { %v912_v13 = vmul.f32 0.33333334, %v227_v12 }
  0x8b LB: >> { %s925_s20 = smul.u32 5, %s697_s16  ;;  %s232_s16 = sadd.s32 1, %s697_s16   ;;  %s697_s16 = sphi %s919_s16, %s232_s16   ;;  %v693_v15 = vphi %v691_v15, %v692_v15  }
  0x8c   : >> { %p231_p9 = scmp.ge.s32.totalorder %s232_s16, %s898_s5 }
  0x8d   : >> { %s237_s7 = sshra.s32 %s925_s20, 7  ;;  %s242_s12 = sand.u32 127, %s925_s20 }
  0x8e   : >> { %s239_s13 = sadd.s32 %s762_s27, %s237_s7  ;;  %s245_s14 = sadd.s32 1, %s925_s20 }
  0x8f   : >> { %s432_s11 = sshll.u32 %s239_s13, 7  ;;  %s246_s15 = sshra.s32 %s245_s14, 7 }
  0x90   : >> { %s243_s17 = sadd.s32 %s432_s11, %s242_s12  ;;  %s248_s22 = sadd.s32 %s762_s27, %s246_s15 }
  0x91   : >> { %s244_s28 = sld [smem:[#allocation4 + %s243_s17]]  ;;  %s433_s30 = sshll.u32 %s248_s22, 7 }
  0x92   : >> { %s251_s18 = sand.u32 127, %s245_s14  ;;  %s254_s19 = sadd.s32 2, %s925_s20 }
  0x93   : >> { %s252_s21 = sadd.s32 %s433_s30, %s251_s18  ;;  %s255_s2 = sshra.s32 %s254_s19, 7 }
  0x94   : >> { %s253_s3 = sld [smem:[#allocation4 + %s252_s21]]  ;;  %s257_s6 = sadd.s32 %s762_s27, %s255_s2 }
  0x95   : >> { %s434_s25 = sshll.u32 %s257_s6, 7  ;;  %s260_s24 = sand.u32 127, %s254_s19 }
  0x96   : >> { %s261_s7 = sadd.s32 %s434_s25, %s260_s24  ;;  %s263_s29 = sadd.s32 3, %s925_s20 }
  0x97   : >> { %s262_s26 = sld [smem:[#allocation4 + %s261_s7]]  ;;  %s264_s13 = sshra.s32 %s263_s29, 7  ;;  %v283_v16 = vstv %s244_s28 }
  0x98   : >> { %s266_s10 = sadd.s32 %s762_s27, %s264_s13  ;;  %s269_s12 = sand.u32 127, %s263_s29  ;;  %v284_v17 = vmax.f32 %v900_v6, %v283_v16 }
  0x99   : >> { %s435_s11 = sshll.u32 %s266_s10, 7  ;;  %s272_s15 = sadd.s32 4, %s925_s20 }
  0x9a   : >> { %s270_s17 = sadd.s32 %s435_s11, %s269_s12  ;;  %s273_s22 = sshra.s32 %s272_s15, 7  ;;  %v289_v19 = vstv %s253_s3 }
  0x9b   : >> { %s271_s14 = sld [smem:[#allocation4 + %s270_s17]]  ;;  %s275_s1 = sadd.s32 %s762_s27, %s273_s22  ;;  %v290_v22 = vmax.f32 %v904_v8, %v289_v19 }
  0x9c   : >> { %s436_s30 = sshll.u32 %s275_s1, 7  ;;  %s278_s18 = sand.u32 127, %s272_s15 }
  0x9d   : >> { %s279_s2 = sadd.s32 %s436_s30, %s278_s18  ;;  %v281_v18 = vstv %s262_s26 }
  0x9e   : >> { %v282_v20 = vmin.f32 %v902_v7, %v281_v18  ;;  %s280_s24 = sld [smem:[#allocation4 + %s279_s2]] }
  0xa0   : >> { %v285_v21 = vsub.f32 %v282_v20, %v284_v17 }
  0xa1   : >> { %v287_v23 = vstv %s271_s14 }
  0xa2   : >> { %v288_v24 = vmin.f32 %v906_v9, %v287_v23  ;;  %v286_v25 = vmax.f32 %v285_v21, 0.0 }
  0xa4   : >> { %v291_v26 = vsub.f32 %v288_v24, %v290_v22  ;;  %v294_v28 = vstv %s280_s24 }
  0xa6   : >> { %v292_v27 = vmax.f32 %v291_v26, 0.0 }
  0xa8   : >> { %v293_v29 = vmul.f32 %v292_v27, %v286_v25  ;;  %234 = sbr.rel (!%p231_p9) target bundleno = 139 (0x8b), region = 96 }
  0xaa   : >> { %v295_v30 = vsub.f32 %v293_v29, %v294_v28 }
  0xac   : >> { %v296_v31 = vmax.f32 %v693_v15, %v295_v30  }
  0xae   : >> { %v692_v15 = vmov %v296_v31   ;;  %v1028_v14 = vmov (%p231_p9), %v296_v31 }
  0xaf PF: > { %v297_v32 = vld [vmem:[%s891_s0] sm:$0xff]  ;;  %vm298_vm0 = vcmp.gt.f32.partialorder %v701_v14, %v912_v13  ;;  %s438_s3 = sshll.u32 %s762_s27, 7  ;;  %s315_s29 = sshll.u32 %s914_s8, 4  ;;  %v701_v14 = vphi %v917_v14, %v1028_v14   ;;  %s316_s29 = int_to_ptr.vmem [resolvable:$true] %s315_s29 }
  0xb0   : > { %v299_v33 = vsel %vm298_vm0, 0.0, %v297_v32  ;;  %s955_s26 = scalar_lea.hbm %s998_s4, %s438_s3  ;;  %s302_s6 = scalar_lea.sflag [#allocation7], %s881_s23 }
  0xb1   : > { %300 = vst [vmem:[%s914_s8] sm:$0xff] %v299_v33  ;;  %s605_s10 = scalar_lea.vmem %s316_s29, 128  ;;  %p1029_p0 = scmp.ne.s32.totalorder %s1019_s9, 0 }
  0xb2   : > { %p606_p7 = scmp.ne.s32.totalorder %s316_s29, %s605_s10  ;;  %s709_s5 = smov [#allocation10]  }
  0xb3   : > { %s609_s0 = sshll.u32 %s709_s5, 4  ;;  %s610_s0 = int_to_ptr.vmem [resolvable:$false] %s609_s0 }
  0xb4   : > { %p607_p1 = pnand %p606_p7, %p1029_p0  ;;  %s611_s16 = scalar_lea.vmem %s610_s0, 256 }
  0xb5   : > { %p612_p5 = scmp.lt.s32.totalorder %s316_s29, %s610_s0  ;;  %p613_p13 = scmp.lt.s32.totalorder %s611_s16, %s605_s10 }
  0xb6   : > { %p608_p3 = pneg %p607_p1 }
  0xb7   : > { %p614_p8 = por %p613_p13, %p612_p5 }
  0xb9   : > { %p615_p4 = pnand %p614_p8, %p608_p3 }
  0xbb   : > { %618 = shalt.err (!%p615_p4)
}
  0xbc   : > { %s619_s27 = scalar_lea.hbm %s955_s26, 128  ;;  %s623_s20 = scalar_lea.hbm %s998_s4, 256 }
  0xbd   : > { %p620_p10 = scmp.ne.s32.totalorder %s955_s26, %s619_s27  ;;  %p624_p11 = scmp.lt.u32.totalorder %s955_s26, %s998_s4 }
  0xbe   : > { %p625_p2 = scmp.lt.u32.totalorder %s623_s20, %s619_s27  ;;  %p627_p7 = scmp.lt.u32.totalorder %s619_s27, %s955_s26 }
  0xbf   : > { %p621_p12 = pnand %p620_p10, %p1029_p0 }
  0xc0   : > { %p626_p9 = por %p625_p2, %p624_p11 }
  0xc1   : > { %p622_p6 = pneg %p621_p12 }
  0xc2   : > { %p628_p1 = por %p627_p7, %p626_p9 }
  0xc4   : > { %p629_p3 = pnand %p628_p1, %p622_p6 }
  0xc6   : > { %632 = shalt.err (!%p629_p3)
}
  0xc7   : > { %446 = dma.vmem_to_hbm [thread:$0]  (%p1029_p0), %s316_s29, 128, %s955_s26, %s302_s6  }
  0xc8 PF: > { %s1030_s21 = sld [smem:[#allocation15_spill]]  ;;  %s1031_s7 = sld [smem:[#allocation21_spill]] }
  0xc9   : > { %s1032_s13 = sld [smem:[#allocation18_spill]] }
  0xce   : > { %s327_s12 = sand.u32 1, %s1030_s21   ;;  %p1033_p5 = scmp.ne.s32.totalorder %s1031_s7, 0 }
  0xcf   : > { %p1034_p13 = scmp.ge.s32.totalorder %s1032_s13, 2  ;;  %s328_s11 = scalar_lea.sflag [#allocation7], %s327_s12 }
  0xd1   : > { %p456_p8 = pnand %p1034_p13, %p1033_p5 }
  0xd3   : > { %672 = dma.done.wait (!%p456_p8), %s328_s11, 128  }
  0xd4   : > { %674 = vsyncadd (!%p456_p8), %s328_s11, 4294967168  ;;  %s1035_s26 = sld [smem:[#allocation19_spill]]  ;;  %s1036_s1 = sld [smem:[#allocation16_spill]] }
  0xd5   : > { %s1037_s24 = sld [smem:[#allocation17_spill]]  ;;  %s1038_s25 = sld [smem:[#allocation20_spill]] }
  0xda   : > { %p30_p4 = scmp.ge.s32.totalorder %s1035_s26, 4  }
  0xdc   :  { %32 = sbr.rel (!%p30_p4) target bundleno = 33 (0x21), region = 107 }
  0xe3   :  { %333 = vsyncpa [#allocation6], 1 }
  0xe4   :  { %335 = vsyncpa [#allocation6 + $0x1], 1 }
  0xe5   :  { %336 = vsyncpa [#allocation9], 1 }
  0xe6   :  { %338 = vsyncpa [#allocation9 + $0x1], 1 }
  0xe7   :  { %339 = vsyncpa [#allocation7], 1 }
  0xe8   :  { %341 = vsyncpa [#allocation7 + $0x1], 1 }

</bundles_post_ra>
